<compile_context>
chip_gen: v6e
topology: v6e:2x2x1
jax: 0.10.0
libtpu: 0.0.40
codegen_flags: <defaults>
</compile_context>

<pallas_src>
import jax
import jax.numpy as jnp
from jax.experimental import pallas as pl
from jax.experimental.pallas import tpu as pltpu


def _round_up(x: int, m: int) -> int:
    return ((x + m - 1) // m) * m


def _cdiv(a: int, b: int) -> int:
    return -(-a // b)


def _dot_attn_kernel(q_ref, k_ref, o_ref):
    # q_ref: (TB, D)     pooled queries for this block of batch elements
    # k_ref: (TB, S, D)  history sequences for this block
    # o_ref: (TB, D)     output (dense store, M=1 squeezed in the wrapper)
    q = q_ref[...]
    k = k_ref[...]
    S = k.shape[1]

    # scores[b, s] = <q[b], k[b, s]>  — VPU broadcast-multiply in the input
    # dtype (bf16-capable on v6e/v7x), lane reduce with f32 accumulation.
    scores = jnp.sum(q[:, None, :] * k, axis=-1, dtype=jnp.float32)      # (TB, S)

    # Numerically-stable softmax over S; the 1/S mean scale is fused into an
    # exact reciprocal (the EUP slot is nowhere near saturated here).
    m = jnp.max(scores, axis=-1, keepdims=True)                          # (TB, 1)
    e = jnp.exp(scores - m)                                              # (TB, S)
    inv = pl.reciprocal(jnp.sum(e, axis=-1, keepdims=True) * S,
                        approx=False)                                    # (TB, 1)
    w = e * inv                                                          # (TB, S) f32

    # mean_s(softmax * k) == sum_s((softmax/S) * k) — multiply in the input
    # dtype, sublane reduce with f32 accumulation.
    out = jnp.sum(w.astype(k.dtype)[:, :, None] * k, axis=1,
                  dtype=jnp.float32)                                     # (TB, D)
    o_ref[...] = out.astype(o_ref.dtype)


def dot_product_attention(pooled_q_seq, q_his, *, block_b=None):
    """pooled_q_seq: (B, 1, D), q_his: (B, S, D) -> (B, 1, D)"""
    B, M, D = pooled_q_seq.shape
    Bk, S, Dk = q_his.shape
    assert B == Bk and D == Dk and M == 1

    itemsize = jnp.dtype(q_his.dtype).itemsize

    # --- per-generation VMEM budget -------------------------------------
    try:
        vmem_cap = int(pltpu.get_tpu_info().vmem_capacity_bytes)
    except Exception:
        vmem_cap = 64 * 1024 * 1024                 # conservative (v7x-sized)
    if vmem_cap >= 128 * 1024 * 1024:               # v5e / v6e
        vmem_limit = 100 * 1024 * 1024
    else:                                           # v7x (64 MiB per TC)
        vmem_limit = min(vmem_cap - 16 * 1024 * 1024, 48 * 1024 * 1024)
    budget = int(0.7 * vmem_limit)

    row_k = S * D * itemsize                        # one batch row of q_his
    row_f32 = S * D * 4                             # one f32 temp row
    per_row = 2 * row_k + 2 * row_f32               # 2x-buffered k + 2 f32 temps

    if block_b is None:
        tb = max(8, (budget // per_row) // 8 * 8)
        if tb >= B:
            # Keep >= 2 grid steps when possible so v7x megacore shards work;
            # tiny batches just take the whole array as one block.
            tb = _round_up(_cdiv(B, 2), 8) if B >= 16 else B
        else:
            # Rebalance so padding waste in the tail block stays small.
            nb = _cdiv(B, tb)
            tb = _round_up(_cdiv(B, nb), 8)
        block_b = tb
    TB = int(block_b)
    num_blocks = _cdiv(B, TB)

    # Triple-buffer the q_his stream when the extra buffer still fits.
    total3 = TB * (3 * row_k + 2 * row_f32)
    k_buffers = 3 if (num_blocks >= 3 and total3 <= int(0.8 * vmem_limit)) else 2
    if k_buffers == 3:
        k_spec = pl.BlockSpec((TB, S, D), lambda b: (b, 0, 0),
                              pipeline_mode=pl.Buffered(3))
    else:
        k_spec = pl.BlockSpec((TB, S, D), lambda b: (b, 0, 0))

    # Squeeze M=1 -> dense (B, D) layout for queries and output.
    q2d = pooled_q_seq.reshape(B, D)

    out2d = pl.pallas_call(
        _dot_attn_kernel,
        out_shape=jax.ShapeDtypeStruct((B, D), pooled_q_seq.dtype),
        grid=(num_blocks,),
        in_specs=[
            pl.BlockSpec((TB, D), lambda b: (b, 0)),
            k_spec,
        ],
        out_specs=pl.BlockSpec((TB, D), lambda b: (b, 0)),
        compiler_params=pltpu.CompilerParams(
            dimension_semantics=("parallel",),
            vmem_limit_bytes=int(vmem_limit),
        ),
    )(q2d, q_his)

    return out2d.reshape(B, 1, D)


def _reference(pooled_q_seq, q_his):
    # Plain-JAX mirror of the PyTorch forward, for correctness checking.
    B = pooled_q_seq.shape[0]
    scores = jnp.einsum("bmd,bsd->bms", pooled_q_seq, q_his)        # (B,1,S)
    w = jax.nn.softmax(scores, axis=-1).reshape(B, -1, 1)           # (B,S,1)
    return jnp.mean(w * q_his, axis=1, keepdims=True)               # (B,1,D)


if __name__ == "__main__":
    key = jax.random.PRNGKey(0)
    B, S, D = 2, 8, 32
    k1, k2 = jax.random.split(key)
    pooled_q_seq = jax.random.normal(k1, (B, 1, D), dtype=jnp.float32)
    q_his = jax.random.normal(k2, (B, S, D), dtype=jnp.float32)

    out = dot_product_attention(pooled_q_seq, q_his)
    out = jax.block_until_ready(out)

    ref = _reference(pooled_q_seq, q_his)
    assert out.shape == (B, 1, D)
    # exact reciprocal + f32 accumulation -> tight tolerance
    assert jnp.allclose(out, ref, atol=1e-5, rtol=1e-5), "mismatch vs reference"

    print("KERNEL_OK")
</pallas_src>

<mosaic_0001>
module attributes {stable_mosaic.version = 11 : i64} {
  func.func @_dot_attn_kernel(%arg0: i32, %arg1: memref<2x32xf32, #tpu.memory_space<vmem>>, %arg2: memref<2x8x32xf32, #tpu.memory_space<vmem>>, %arg3: memref<2x32xf32, #tpu.memory_space<vmem>>) attributes {dimension_semantics = [#tpu.dimension_semantics<parallel>], iteration_bounds = array<i64: 1>, scalar_prefetch = 0 : i64, scratch_operands = 0 : i64, tpu.core_type = #tpu.core_type<tc>, window_params = [{transform_indices = @transform_0, window_bounds = array<i64: 2, 32>}, {transform_indices = @transform_1, window_bounds = array<i64: 2, 8, 32>}, {transform_indices = @transform_2, window_bounds = array<i64: 2, 32>}]} {
    %c0 = arith.constant 0 : index
    %c0_0 = arith.constant 0 : index
    %0 = vector.load %arg1[%c0, %c0_0] : memref<2x32xf32, #tpu.memory_space<vmem>>, vector<2x32xf32>
    %c0_1 = arith.constant 0 : index
    %c0_2 = arith.constant 0 : index
    %c0_3 = arith.constant 0 : index
    %1 = vector.load %arg2[%c0_1, %c0_2, %c0_3] : memref<2x8x32xf32, #tpu.memory_space<vmem>>, vector<2x8x32xf32>
    %2 = vector.shape_cast %0 : vector<2x32xf32> to vector<2x1x32xf32>
    %3 = vector.broadcast %2 : vector<2x1x32xf32> to vector<2x8x32xf32>
    %4 = arith.mulf %3, %1 : vector<2x8x32xf32>
    %cst = arith.constant dense<0.000000e+00> : vector<2x8xf32>
    %5 = vector.multi_reduction <add>, %4, %cst [2] : vector<2x8x32xf32> to vector<2x8xf32>
    %cst_4 = arith.constant dense<0xFF800000> : vector<2xf32>
    %6 = vector.multi_reduction <maximumf>, %5, %cst_4 [1] : vector<2x8xf32> to vector<2xf32>
    %7 = vector.shape_cast %6 : vector<2xf32> to vector<2x1xf32>
    %8 = vector.broadcast %7 : vector<2x1xf32> to vector<2x8xf32>
    %9 = arith.subf %5, %8 : vector<2x8xf32>
    %10 = math.exp %9 : vector<2x8xf32>
    %cst_5 = arith.constant dense<0.000000e+00> : vector<2xf32>
    %11 = vector.multi_reduction <add>, %10, %cst_5 [1] : vector<2x8xf32> to vector<2xf32>
    %12 = vector.shape_cast %11 : vector<2xf32> to vector<2x1xf32>
    %cst_6 = arith.constant 8.000000e+00 : f32
    %13 = vector.broadcast %cst_6 : f32 to vector<2x1xf32>
    %14 = arith.mulf %12, %13 : vector<2x1xf32>
    %15 = tpu.reciprocal %14 : vector<2x1xf32> -> vector<2x1xf32>
    %16 = vector.broadcast %15 : vector<2x1xf32> to vector<2x8xf32>
    %17 = arith.mulf %10, %16 : vector<2x8xf32>
    %18 = vector.shape_cast %17 : vector<2x8xf32> to vector<2x8x1xf32>
    %19 = vector.broadcast %18 : vector<2x8x1xf32> to vector<2x8x32xf32>
    %20 = arith.mulf %19, %1 : vector<2x8x32xf32>
    %cst_7 = arith.constant dense<0.000000e+00> : vector<2x32xf32>
    %21 = vector.multi_reduction <add>, %20, %cst_7 [1] : vector<2x8x32xf32> to vector<2x32xf32>
    %c0_8 = arith.constant 0 : index
    %c0_9 = arith.constant 0 : index
    %22 = vector.load %arg3[%c0_8, %c0_9] : memref<2x32xf32, #tpu.memory_space<vmem>>, vector<2x32xf32>
    tpu.vector_store %arg3[%c0_8, %c0_9], %21 {strides = array<i32>} : memref<2x32xf32, #tpu.memory_space<vmem>>, vector<2x32xf32>,
    return
  }
  func.func @transform_0(%arg0: i32) -> (i32, i32) {
    %c0_i32 = arith.constant 0 : i32
    %c0_i32_0 = arith.constant 0 : i32
    return %arg0, %c0_i32 : i32, i32
  }
  func.func @transform_1(%arg0: i32) -> (i32, i32, i32) {
    %c0_i32 = arith.constant 0 : i32
    %c0_i32_0 = arith.constant 0 : i32
    %c0_i32_1 = arith.constant 0 : i32
    return %arg0, %c0_i32, %c0_i32_0 : i32, i32, i32
  }
  func.func @transform_2(%arg0: i32) -> (i32, i32) {
    %c0_i32 = arith.constant 0 : i32
    %c0_i32_0 = arith.constant 0 : i32
    return %arg0, %c0_i32 : i32, i32
  }
}

</mosaic_0001>

<bundles_post_ra>
// kernel: tpu_custom_call.1
= control target key start
LH: loop header
LB: loop body
LE: loop exit
PB: predicated region body
PF: predicated region fallthrough
CT: control target
= control target key end

     0   :  { %7 = vsyncpa [#allocation3], 0  ;;  %s325_s0 = inlined_call_operand.hbm [shape: f32[2,32], index: 0, kind: input, shape index: {}]   ;;  %s326_s1 = inlined_call_operand.hbm [shape: f32[2,8,32], index: 1, kind: input, shape index: {}]   ;;  %s327_s2 = inlined_call_operand.hbm [shape: f32[2,32], index: 2, kind: output, shape index: {}]  }
   0x1   :  { %8 = vsyncpa [#allocation6], 0 }
   0x2   :  { %9 = vsyncpa [#allocation4], 0  ;;  %s285_s9 = smov [#allocation2]   ;;  %s286_s11 = smov [#allocation5]  }
   0x3   :  { %s16_s10 = sshll.u32 %s285_s9, 4  ;;  %s25_s12 = sshll.u32 %s286_s11, 4  ;;  %s17_s10 = int_to_ptr.vmem [resolvable:$true] %s16_s10  ;;  %s26_s12 = int_to_ptr.vmem [resolvable:$true] %s25_s12 }
   0x4   :  { %s227_s13 = scalar_lea.vmem %s17_s10, 32  ;;  %p232_p1 = scmp.lt.s32.totalorder %s17_s10, %s17_s10 }
   0x5   :  { %p228_p0 = scmp.ne.s32.totalorder %s17_s10, %s227_s13  ;;  %p233_p2 = scmp.lt.s32.totalorder %s227_s13, %s227_s13 }
   0x7   :  { %p234_p3 = por %p233_p2, %p232_p1 }
   0x9   :  { %p235_p4 = pnand %p234_p3, %p228_p0 }
   0xb   :  { %238 = shalt.err (!%p235_p4)
}
   0xc   :  { %19 = dma.hbm_to_vmem [thread:$0]  %s325_s0, 32, %s17_s10, [#allocation3]  }
   0xd   :  { %s247_s16 = scalar_lea.vmem %s26_s12, 256  ;;  %p252_p6 = scmp.lt.s32.totalorder %s26_s12, %s26_s12 }
   0xe   :  { %p248_p5 = scmp.ne.s32.totalorder %s26_s12, %s247_s16  ;;  %p253_p7 = scmp.lt.s32.totalorder %s247_s16, %s247_s16 }
  0x10   :  { %p254_p8 = por %p253_p7, %p252_p6 }
  0x12   :  { %p255_p9 = pnand %p254_p8, %p248_p5 }
  0x14   :  { %258 = shalt.err (!%p255_p9)
}
  0x15   :  { %s287_s17 = smov 128   ;;  %s288_s18 = smov 8  }
  0x16   :  { %31 = dma.hbm_to_vmem [thread:$0]  %s326_s1, 256, %s26_s12, [#allocation6], %s287_s17, %s287_s17, %s288_s18  }
  0x17   :  { %279 = dma.done.wait [#allocation3], 32  }
  0x18   :  { %280 = vsyncadd [#allocation3], 4294967264 }
  0x19   :  { %281 = dma.done.wait [#allocation6], 256  }
  0x1a   :  { %282 = vsyncadd [#allocation6], 4294967040  ;;  %v53_v0 = vlaneseq  ;;  %v289_v1 = vmov 1966171168   ;;  %v39_v12 = vld [vmem:[#allocation5] sm:$0xff]  ;;  %vm76_vm0 = vcmask 261120  }
  0x1b   :  { %v51_v2 = vunpack.c.l.s4 %v289_v1  ;;  %v203_v9 = vld.sshfl [vmem:[#allocation2] sm:$0x11 pattern:$0x75316420]  ;;  %v40_v15 = vld [vmem:[#allocation5 + $0x8] sm:$0xff]  ;;  %vm95_vm1 = vcmask 1041409  }
  0x1c   :  { %v54_v3 = vshrl.u32 %v53_v0, 7  ;;  %v86_v4 = vand.u32 127, %v53_v0  ;;  %v49_v11 = vcombine.high %v203_v9, %v203_v9  ;;  %vm98_vm2 = vcmask 58368   ;;  %s291_s0 = smov [#allocation7]  }
  0x1d   :  { %v52_v5 = vunpack.c.0.s8 %v51_v2  ;;  %v290_v27 = vmov 0   ;;  %s193_s1 = sshll.u32 %s291_s0, 4  ;;  %vm185_vm3 = vcmask 254976   ;;  %s194_s1 = int_to_ptr.vmem [resolvable:$true] %s193_s1 }
  0x1e   :  { %v89_v6 = vsub.s32 %v86_v4, %v54_v3  ;;  %v66_v8 = vsub.s32 0, %v54_v3  ;;  %212 = vset.pattern.permute.xlu0 %v290_v27  ;;  %211 = vset.pattern.permute.xlu1 %v290_v27  ;;  %v109_v28 = vsub.s32 1, %v54_v3  ;;  %s259_s21 = scalar_lea.vmem %s194_s1, 32  ;;  %p264_p11 = scmp.lt.s32.totalorder %s194_s1, %s194_s1 }
  0x1f   :  { %v55_v7 = vsub.s32 %v52_v5, %v54_v3  ;;  %p260_p10 = scmp.ne.s32.totalorder %s194_s1, %s259_s21  ;;  %p265_p12 = scmp.lt.s32.totalorder %s259_s21, %s259_s21 }
  0x21   :  { %v56_v10 = vrot.slane %v203_v9, %v55_v7  ;;  %v63_v14 = vrot.slane %v49_v11, %v55_v7  ;;  %p266_p13 = por %p265_p12, %p264_p11 }
  0x23   :  { %v67_v13 = vrot.slane %v56_v10, %v66_v8  ;;  %v71_v17 = vrot.slane %v63_v14, %v66_v8  ;;  %p267_p0 = pnand %p266_p13, %p260_p10 }
  0x25   :  { %v74_v16 = vmul.f32 %v67_v13, %v39_v12  ;;  %v75_v19 = vmul.f32 %v71_v17, %v40_v15 }
  0x27   :  { %v77_v18 = vsel %vm76_vm0, %v74_v16, 0.0  ;;  %v80_v20 = vsel %vm76_vm0, %v75_v19, 0.0 }
  0x28   :  { %78 = vadd.xlane.f32.xlu0 %v77_v18 }
  0x2c   :  { %81 = vadd.xlane.f32.xlu0 %v80_v20 }
  0xb1   :  { %v79_v21 = vpop.xlane.xlu0 %78 }
  0xb2   :  { %v90_v23 = vrot.slane %v79_v21, %v89_v6 }
  0xb5   :  { %v82_v22 = vpop.xlane.xlu0 %81 }
  0xb6   :  { %v94_v24 = vrot.slane %v82_v22, %v89_v6 }
  0xb8   :  { %v96_v25 = vsel %vm95_vm1, %v94_v24, %v90_v23 }
  0xb9   :  { %v99_v26 = vsel %vm98_vm2, %v96_v25, -inf }
  0xba   :  { %100 = vmax.xlane.f32.xlu1 %v99_v26 }
 0x143   :  { %v101_v29 = vpop.xlane.xlu1 %100 }
 0x144   :  { %v106_v30 = vrot.slane %v101_v29, %v66_v8  ;;  %v110_v31 = vrot.slane %v101_v29, %v109_v28 }
 0x146   :  { %v113_v32 = vsub.f32 %v79_v21, %v106_v30  ;;  %v114_v33 = vsub.f32 %v82_v22, %v110_v31 }
 0x148   :  { %v115_v34 = vmul.f32 1.442695, %v113_v32  ;;  %v117_v35 = vmul.f32 1.442695, %v114_v33 }
 0x14a   :  { %213 = vpow2.f32 %v115_v34 }
 0x14b   :  { %215 = vpow2.f32 %v117_v35 }
 0x157   :  { %v214_v36 = vpop.eup %213 }
 0x158   :  { %v216_v37 = vpop.eup %215  ;;  %122 = vperm.xlu1 %211, %v214_v36  }
 0x159   :  { %125 = vperm.xlu0 %212, %v216_v37  }
 0x1d3   :  { %v123_v38 = vpop.permute.xlu1 %122 }
 0x1d4   :  { %v126_v39 = vpop.permute.xlu0 %125  ;;  %v130_v40 = vrot.slane %v123_v38, %v89_v6 }
 0x1d5   :  { %v134_v41 = vrot.slane %v126_v39, %v89_v6 }
 0x1d7   :  { %v135_v42 = vsel %vm95_vm1, %v134_v41, %v130_v40 }
 0x1d8   :  { %v137_v43 = vsel %vm98_vm2, %v135_v42, 0.0 }
 0x1d9   :  { %138 = vadd.xlane.f32.xlu1 %v137_v43 }
 0x262   :  { %v139_v44 = vpop.xlane.xlu1 %138 }
 0x263   :  { %v140_v45 = vmul.f32 8.0, %v139_v44 }
 0x265   :  { %217 = vrcp.f32 %v140_v45 }
 0x272   :  { %v218_v46 = vpop.eup %217 }
 0x273   :  { %v146_v47 = vrot.slane %v218_v46, %v66_v8  ;;  %v150_v49 = vrot.slane %v218_v46, %v109_v28 }
 0x275   :  { %v153_v48 = vmul.f32 %v214_v36, %v146_v47  ;;  %v154_v50 = vmul.f32 %v216_v37, %v150_v49 }
 0x277   :  { %157 = vperm.xlu0 %212, %v153_v48  }
 0x27b   :  { %162 = vperm.xlu0 %212, %v154_v50  }
 0x2f2   :  { %v158_v51 = vpop.permute.xlu0 %157 }
 0x2f3   :  { %v165_v52 = vmul.f32 %v158_v51, %v39_v12 }
 0x2f5   :  { %v167_v53 = vsel %vm76_vm0, %v165_v52, 0.0 }
 0x2f6   :  { %v168_v54 = vrot.slane %v167_v53, 4  ;;  %v163_v55 = vpop.permute.xlu0 %162 }
 0x2f7   :  { %v166_v56 = vmul.f32 %v163_v55, %v40_v15 }
 0x2f8   :  { %v169_v57 = vadd.f32 %v168_v54, %v167_v53 }
 0x2f9   :  { %v174_v58 = vsel %vm76_vm0, %v166_v56, 0.0 }
 0x2fa   :  { %v170_v59 = vrot.slane %v169_v57, 2  ;;  %v175_v60 = vrot.slane %v174_v58, 4 }
 0x2fc   :  { %v171_v61 = vadd.f32 %v170_v59, %v169_v57  ;;  %v176_v62 = vadd.f32 %v175_v60, %v174_v58 }
 0x2fe   :  { %v177_v63 = vrot.slane %v176_v62, 2  ;;  %v172_v0 = vrot.slane %v171_v61, 1 }
 0x300   :  { %v178_v1 = vadd.f32 %v177_v63, %v176_v62  ;;  %v173_v3 = vadd.f32 %v172_v0, %v171_v61 }
 0x302   :  { %v179_v2 = vrot.slane %v178_v1, 1 }
 0x304   :  { %v180_v4 = vadd.f32 %v179_v2, %v178_v1 }
 0x306   :  { %v183_v5 = vsel %vm95_vm1, %v180_v4, %v173_v3 }
 0x307   :  { %186 = vst.msk [vmem:[#allocation7] sm:$0x3] %vm185_vm3, %v183_v5 }
 0x308   :  { %270 = shalt.err (!%p267_p0)
}
 0x309   :  { %196 = dma.vmem_to_hbm [thread:$0]  %s194_s1, 32, %s327_s2, [#allocation4]  }
 0x30a   :  { %283 = dma.done.wait [#allocation4], 32  }
 0x30b   :  { %284 = vsyncadd [#allocation4], 4294967264 }
 0x30c   :  { %200 = vsyncpa [#allocation3], 1 }
 0x30d   :  { %201 = vsyncpa [#allocation6], 1 }
 0x30e   :  { %202 = vsyncpa [#allocation4], 1 }

</bundles_post_ra>
